<compile_context>
chip_gen: v7x
topology: tpu7x:2x2x1
jax: 0.10.0
libtpu: 0.0.40
codegen_flags: <defaults>
</compile_context>

<pallas_src>
import functools

import jax
import jax.numpy as jnp
from jax import lax
from jax.experimental import pallas as pl
from jax.experimental.pallas import tpu as pltpu


def _dwsep_kernel(wd_ref, pw_ref, x_ref, o_ref, *, tap_offsets, hw_lane):
    """One grid step: `nb` batch elements, all channels, spatial on lanes.

    wd_ref: VMEM (nc, ntap)        depthwise tap weights per row (= batch-local channel)
    pw_ref: VMEM (ncout, nc)       block-diagonal pointwise matrix (Cout x Cin per batch elem)
    x_ref : VMEM (1, nc, hw_lane)  flattened padded input rows (lane-dense)
    o_ref : VMEM (1, ncout, hw_lane) flattened output rows (lane-dense, single store)
    """
    x = x_ref[0].astype(jnp.float32)            # (nc, hw_lane), HW on lanes
    wd = wd_ref[...]                            # (nc, ntap) f32

    # Depthwise: each tap is a cyclic lane shift of the whole slab + broadcast FMA.
    # Wrapped-around lanes only land on positions the wrapper crops, so roll is safe.
    acc = wd[:, 0:1] * x                        # tap (0, 0), offset 0, seeds the accumulator
    for t, off in enumerate(tap_offsets):
        if t == 0:
            continue
        shifted = pltpu.roll(x, shift=hw_lane - off, axis=1)   # == jnp.roll(x, -off, axis=1)
        acc = acc + wd[:, t:t + 1] * shifted

    # Pointwise 1x1: one tiny block-diagonal matmul mixes channels across sublanes
    # and yields the full lane-dense output slab in one shot.
    out = jnp.dot(pw_ref[...], acc, preferred_element_type=jnp.float32)
    o_ref[0] = out.astype(o_ref.dtype)          # single unmasked lane-dense store


def _tensorcores_per_chip() -> int:
    """Best-effort TC-per-chip detection (v7x has 2); conservative default 1."""
    try:
        kind = jax.devices()[0].device_kind.lower()
    except Exception:
        return 1
    if "v7" in kind or "7x" in kind:
        return 2
    return 1


def depthwise_separable_conv2d(x_nchw, dw_weight, pw_weight,
                               stride=1, padding=0, dilation=1,
                               batch_split=None):
    """x_nchw: (N, Cin, H, W); dw_weight: (Cin, 1, KH, KW); pw_weight: (Cout, Cin, 1, 1)."""
    n, cin, h, w = x_nchw.shape
    kh, kw = int(dw_weight.shape[2]), int(dw_weight.shape[3])
    cout = int(pw_weight.shape[0])

    oh = (h + 2 * padding - dilation * (kh - 1) - 1) // stride + 1
    ow = (w + 2 * padding - dilation * (kw - 1) - 1) // stride + 1
    assert oh > 0 and ow > 0

    # Spatial zero-padding only when needed (NCHW kept end-to-end, no transposes).
    if padding > 0:
        x_p = jnp.pad(x_nchw, ((0, 0), (0, 0),
                               (padding, padding), (padding, padding)))
    else:
        x_p = x_nchw
    h_pad, w_pad = x_p.shape[2], x_p.shape[3]
    hw = h_pad * w_pad
    hw_lane = ((hw + 127) // 128) * 128          # lane-dense flat spatial length

    # Grid: 1 step (batch folded) on 1-TC chips; 2-way parallel on v7x.
    if batch_split is None:
        batch_split = 2 if (_tensorcores_per_chip() >= 2 and n >= 2 and n % 2 == 0) else 1
    g = batch_split
    assert n % g == 0
    nb = n // g
    nc = nb * cin
    ncout = nb * cout
    ntap = kh * kw

    # Flatten spatial onto the lane axis (contiguous reshape; no data movement),
    # pad lanes to a multiple of 128, and group batch elements per grid step.
    x_flat = x_p.reshape(n, cin, hw)
    if hw_lane != hw:
        x_flat = jnp.pad(x_flat, ((0, 0), (0, 0), (0, hw_lane - hw)))
    x_blocks = x_flat.reshape(g, nc, hw_lane)

    # Tiny weight operands (fetched into VMEM once; constant index_maps).
    wd_cols = jnp.tile(dw_weight.reshape(cin, ntap).astype(jnp.float32), (nb, 1))   # (nc, ntap)
    pw_mat = pw_weight.reshape(cout, cin).astype(jnp.float32)                       # (Cout, Cin)
    pw_bd = jnp.kron(jnp.eye(nb, dtype=jnp.float32), pw_mat)                        # (ncout, nc)

    # Static flat-lane offset of each depthwise tap (row-major in the padded frame).
    tap_offsets = tuple(dilation * (ki * w_pad + kj)
                        for ki in range(kh) for kj in range(kw))

    kernel = functools.partial(_dwsep_kernel,
                               tap_offsets=tap_offsets, hw_lane=hw_lane)

    out_flat = pl.pallas_call(
        kernel,
        out_shape=jax.ShapeDtypeStruct((g, ncout, hw_lane), x_nchw.dtype),
        grid=(g,),
        in_specs=[
            pl.BlockSpec((nc, ntap), lambda i: (0, 0)),            # depthwise weights
            pl.BlockSpec((ncout, nc), lambda i: (0, 0)),           # pointwise block-diag
            pl.BlockSpec((1, nc, hw_lane), lambda i: (i, 0, 0)),   # input slab
        ],
        out_specs=pl.BlockSpec((1, ncout, hw_lane), lambda i: (i, 0, 0)),
        compiler_params=pltpu.CompilerParams(
            dimension_semantics=("parallel",)),
    )(wd_cols, pw_bd, x_blocks)

    # Back to NCHW: crop lane padding, unflatten, keep valid (strided) anchors.
    out = out_flat.reshape(n, cout, hw_lane)[:, :, :hw].reshape(n, cout, h_pad, w_pad)
    out = out[:, :,
              : (oh - 1) * stride + 1 : stride,
              : (ow - 1) * stride + 1 : stride]
    return out


def _reference(x_nchw, dw_weight, pw_weight, stride, padding, dilation):
    cin = x_nchw.shape[1]
    dw = lax.conv_general_dilated(
        x_nchw, dw_weight,
        window_strides=(stride, stride),
        padding=((padding, padding), (padding, padding)),
        rhs_dilation=(dilation, dilation),
        dimension_numbers=("NCHW", "OIHW", "NCHW"),
        feature_group_count=cin)
    return lax.conv_general_dilated(
        dw, pw_weight,
        window_strides=(1, 1),
        padding=((0, 0), (0, 0)),
        dimension_numbers=("NCHW", "OIHW", "NCHW"))


if __name__ == "__main__":
    # Small shapes consistent with the module: batch=2, Cin=4, Cout=8, 16x16, k=3.
    N, CIN, COUT, H, W, K = 2, 4, 8, 16, 16, 3
    STRIDE, PADDING, DILATION = 1, 0, 1

    key = jax.random.PRNGKey(0)
    kx, kdw, kpw = jax.random.split(key, 3)

    x = jax.random.normal(kx, (N, CIN, H, W), dtype=jnp.float32)
    dw_bound = 1.0 / (K * K) ** 0.5
    pw_bound = 1.0 / CIN ** 0.5
    dw_weight = jax.random.uniform(kdw, (CIN, 1, K, K), jnp.float32,
                                   -dw_bound, dw_bound)
    pw_weight = jax.random.uniform(kpw, (COUT, CIN, 1, 1), jnp.float32,
                                   -pw_bound, pw_bound)

    out = depthwise_separable_conv2d(x, dw_weight, pw_weight,
                                     stride=STRIDE, padding=PADDING,
                                     dilation=DILATION)
    out = jax.block_until_ready(out)

    ref = _reference(x, dw_weight, pw_weight, STRIDE, PADDING, DILATION)
    assert out.shape == ref.shape, (out.shape, ref.shape)
    assert jnp.allclose(out, ref, atol=1e-4, rtol=1e-4), "mismatch vs reference"

    print("KERNEL_OK")
</pallas_src>

<mosaic_0001>
module attributes {stable_mosaic.version = 11 : i64} {
  func.func @_dwsep_kernel(%arg0: i32, %arg1: memref<8x9xf32, #tpu.memory_space<vmem>>, %arg2: memref<16x8xf32, #tpu.memory_space<vmem>>, %arg3: memref<1x8x256xf32, #tpu.memory_space<vmem>>, %arg4: memref<1x16x256xf32, #tpu.memory_space<vmem>>) attributes {dimension_semantics = [#tpu.dimension_semantics<parallel>], iteration_bounds = array<i64: 1>, scalar_prefetch = 0 : i64, scratch_operands = 0 : i64, tpu.core_type = #tpu.core_type<tc>, window_params = [{pipeline_mode = #tpu.pipeline_mode<synchronous>, transform_indices = @transform_0, window_bounds = array<i64: 8, 9>}, {pipeline_mode = #tpu.pipeline_mode<synchronous>, transform_indices = @transform_1, window_bounds = array<i64: 16, 8>}, {transform_indices = @transform_2, window_bounds = array<i64: 1, 8, 256>}, {transform_indices = @transform_3, window_bounds = array<i64: 1, 16, 256>}]} {
    %c0 = arith.constant 0 : index
    %c0_0 = arith.constant 0 : index
    %c0_1 = arith.constant 0 : index
    %0 = vector.load %arg3[%c0, %c0_0, %c0_1] : memref<1x8x256xf32, #tpu.memory_space<vmem>>, vector<1x8x256xf32>
    %1 = vector.shape_cast %0 : vector<1x8x256xf32> to vector<8x256xf32>
    %c0_2 = arith.constant 0 : index
    %c0_3 = arith.constant 0 : index
    %2 = vector.load %arg1[%c0_2, %c0_3] : memref<8x9xf32, #tpu.memory_space<vmem>>, vector<8x9xf32>
    %3 = vector.extract_strided_slice %2 {offsets = [0, 0], sizes = [8, 1], strides = [1, 1]} : vector<8x9xf32> to vector<8x1xf32>
    %4 = vector.broadcast %3 : vector<8x1xf32> to vector<8x256xf32>
    %5 = arith.mulf %4, %1 : vector<8x256xf32>
    %c255_i32 = arith.constant 255 : i32
    %6 = tpu.dynamic_rotate %1 by %c255_i32 dim 1 : vector<8x256xf32>, i32 -> vector<8x256xf32>
    %7 = vector.extract_strided_slice %2 {offsets = [0, 1], sizes = [8, 1], strides = [1, 1]} : vector<8x9xf32> to vector<8x1xf32>
    %8 = vector.broadcast %7 : vector<8x1xf32> to vector<8x256xf32>
    %9 = arith.mulf %8, %6 : vector<8x256xf32>
    %10 = arith.addf %5, %9 : vector<8x256xf32>
    %c254_i32 = arith.constant 254 : i32
    %11 = tpu.dynamic_rotate %1 by %c254_i32 dim 1 : vector<8x256xf32>, i32 -> vector<8x256xf32>
    %12 = vector.extract_strided_slice %2 {offsets = [0, 2], sizes = [8, 1], strides = [1, 1]} : vector<8x9xf32> to vector<8x1xf32>
    %13 = vector.broadcast %12 : vector<8x1xf32> to vector<8x256xf32>
    %14 = arith.mulf %13, %11 : vector<8x256xf32>
    %15 = arith.addf %10, %14 : vector<8x256xf32>
    %c240_i32 = arith.constant 240 : i32
    %16 = tpu.dynamic_rotate %1 by %c240_i32 dim 1 : vector<8x256xf32>, i32 -> vector<8x256xf32>
    %17 = vector.extract_strided_slice %2 {offsets = [0, 3], sizes = [8, 1], strides = [1, 1]} : vector<8x9xf32> to vector<8x1xf32>
    %18 = vector.broadcast %17 : vector<8x1xf32> to vector<8x256xf32>
    %19 = arith.mulf %18, %16 : vector<8x256xf32>
    %20 = arith.addf %15, %19 : vector<8x256xf32>
    %c239_i32 = arith.constant 239 : i32
    %21 = tpu.dynamic_rotate %1 by %c239_i32 dim 1 : vector<8x256xf32>, i32 -> vector<8x256xf32>
    %22 = vector.extract_strided_slice %2 {offsets = [0, 4], sizes = [8, 1], strides = [1, 1]} : vector<8x9xf32> to vector<8x1xf32>
    %23 = vector.broadcast %22 : vector<8x1xf32> to vector<8x256xf32>
    %24 = arith.mulf %23, %21 : vector<8x256xf32>
    %25 = arith.addf %20, %24 : vector<8x256xf32>
    %c238_i32 = arith.constant 238 : i32
    %26 = tpu.dynamic_rotate %1 by %c238_i32 dim 1 : vector<8x256xf32>, i32 -> vector<8x256xf32>
    %27 = vector.extract_strided_slice %2 {offsets = [0, 5], sizes = [8, 1], strides = [1, 1]} : vector<8x9xf32> to vector<8x1xf32>
    %28 = vector.broadcast %27 : vector<8x1xf32> to vector<8x256xf32>
    %29 = arith.mulf %28, %26 : vector<8x256xf32>
    %30 = arith.addf %25, %29 : vector<8x256xf32>
    %c224_i32 = arith.constant 224 : i32
    %31 = tpu.dynamic_rotate %1 by %c224_i32 dim 1 : vector<8x256xf32>, i32 -> vector<8x256xf32>
    %32 = vector.extract_strided_slice %2 {offsets = [0, 6], sizes = [8, 1], strides = [1, 1]} : vector<8x9xf32> to vector<8x1xf32>
    %33 = vector.broadcast %32 : vector<8x1xf32> to vector<8x256xf32>
    %34 = arith.mulf %33, %31 : vector<8x256xf32>
    %35 = arith.addf %30, %34 : vector<8x256xf32>
    %c223_i32 = arith.constant 223 : i32
    %36 = tpu.dynamic_rotate %1 by %c223_i32 dim 1 : vector<8x256xf32>, i32 -> vector<8x256xf32>
    %37 = vector.extract_strided_slice %2 {offsets = [0, 7], sizes = [8, 1], strides = [1, 1]} : vector<8x9xf32> to vector<8x1xf32>
    %38 = vector.broadcast %37 : vector<8x1xf32> to vector<8x256xf32>
    %39 = arith.mulf %38, %36 : vector<8x256xf32>
    %40 = arith.addf %35, %39 : vector<8x256xf32>
    %c222_i32 = arith.constant 222 : i32
    %41 = tpu.dynamic_rotate %1 by %c222_i32 dim 1 : vector<8x256xf32>, i32 -> vector<8x256xf32>
    %42 = vector.extract_strided_slice %2 {offsets = [0, 8], sizes = [8, 1], strides = [1, 1]} : vector<8x9xf32> to vector<8x1xf32>
    %43 = vector.broadcast %42 : vector<8x1xf32> to vector<8x256xf32>
    %44 = arith.mulf %43, %41 : vector<8x256xf32>
    %45 = arith.addf %40, %44 : vector<8x256xf32>
    %c0_4 = arith.constant 0 : index
    %c0_5 = arith.constant 0 : index
    %46 = vector.load %arg2[%c0_4, %c0_5] : memref<16x8xf32, #tpu.memory_space<vmem>>, vector<16x8xf32>
    %cst = arith.constant dense<0.000000e+00> : vector<16x256xf32>
    %47 = tpu.matmul %46, %45, %cst {dimension_numbers = #tpu.dot_dimension_numbers<[1], [0], [0], [1], [0, 0, 1, 1], [], []>} : vector<16x8xf32>, vector<8x256xf32>, vector<16x256xf32> -> vector<16x256xf32>
    %c0_6 = arith.constant 0 : index
    %c0_7 = arith.constant 0 : index
    %c0_8 = arith.constant 0 : index
    %48 = vector.load %arg4[%c0_6, %c0_7, %c0_8] : memref<1x16x256xf32, #tpu.memory_space<vmem>>, vector<1x16x256xf32>
    %49 = vector.shape_cast %48 : vector<1x16x256xf32> to vector<16x256xf32>
    %50 = vector.shape_cast %47 : vector<16x256xf32> to vector<1x16x256xf32>
    tpu.vector_store %arg4[%c0_6, %c0_7, %c0_8], %50 {strides = array<i32>} : memref<1x16x256xf32, #tpu.memory_space<vmem>>, vector<1x16x256xf32>,
    return
  }
  func.func @transform_0(%arg0: i32) -> (i32, i32) {
    %c0_i32 = arith.constant 0 : i32
    %c0_i32_0 = arith.constant 0 : i32
    %c0_i32_1 = arith.constant 0 : i32
    return %c0_i32, %c0_i32_0 : i32, i32
  }
  func.func @transform_1(%arg0: i32) -> (i32, i32) {
    %c0_i32 = arith.constant 0 : i32
    %c0_i32_0 = arith.constant 0 : i32
    %c0_i32_1 = arith.constant 0 : i32
    return %c0_i32, %c0_i32_0 : i32, i32
  }
  func.func @transform_2(%arg0: i32) -> (i32, i32, i32) {
    %c0_i32 = arith.constant 0 : i32
    %c0_i32_0 = arith.constant 0 : i32
    %c0_i32_1 = arith.constant 0 : i32
    return %arg0, %c0_i32, %c0_i32_0 : i32, i32, i32
  }
  func.func @transform_3(%arg0: i32) -> (i32, i32, i32) {
    %c0_i32 = arith.constant 0 : i32
    %c0_i32_0 = arith.constant 0 : i32
    %c0_i32_1 = arith.constant 0 : i32
    return %arg0, %c0_i32, %c0_i32_0 : i32, i32, i32
  }
}

</mosaic_0001>

<bundles_post_ra>
// kernel: tpu_custom_call.1
= control target key start
LH: loop header
LB: loop body
LE: loop exit
PB: predicated region body
PF: predicated region fallthrough
CT: control target
= control target key end

     0   :  { %v311_v1 = vmov 2   ;;  %v312_v2 = vmov 0   ;;  %s411_s0 = inlined_call_operand.vmem [shape: f32[8,9], index: 0, kind: input, shape index: {}]   ;;  %s412_s1 = inlined_call_operand.vmem [shape: f32[16,8], index: 1, kind: input, shape index: {}]   ;;  %s413_s2 = inlined_call_operand.vmem [shape: f32[1,8,256], index: 2, kind: input, shape index: {}]   ;;  %s414_s3 = inlined_call_operand.hbm [shape: f32[1,16,256], index: 3, kind: output, shape index: {}]  }
   0x1   :  { %v17_v0 = vld [vmem:[%s411_s0] sm:$0xff]  ;;  %280 = vset.pattern.permute.xlu1 %v311_v1  ;;  %278 = vset.pattern.permute.xlu0 %v312_v2 }
   0x2   :  { %50 = vperm.xlu1 %280, %v17_v0   ;;  %20 = vperm.xlu0 %278, %v17_v0  }
   0x3   :  { %8 = vsyncpa [#allocation3], 0  ;;  %v313_v3 = vmov 3   ;;  %v314_v4 = vmov 1   ;;  %v358_v5 = vld [vmem:[%s413_s2] sm:$0xff]  ;;  %v363_v6 = vld [vmem:[%s413_s2 + $0x8] sm:$0xff]  ;;  %v29_v25 = vlaneseq }
   0x4   :  { %s315_s17 = smov 127   ;;  %v316_v7 = vmov 4   ;;  %v317_v8 = vmov 5   ;;  %s318_s18 = smov 126   ;;  %v320_v9 = vmov 6   ;;  %v321_v10 = vmov 7  }
   0x5   :  { %s319_s19 = smov 112   ;;  %s322_s2 = smov 111   ;;  %v323_v11 = vmov 8   ;;  %v328_v12 = vmov 0.0   ;;  %v381_v28 = vand.u32 127, %v29_v25  ;;  %vm149_vm8 = vcmask 64512  }
   0x6   :  { %281 = vset.pattern.permute.xlu1 %v313_v3  ;;  %279 = vset.pattern.permute.xlu0 %v314_v4  ;;  %s324_s20 = smov 95   ;;  %s325_s21 = smov 110  }
   0x7   :  { %65 = vperm.xlu1 %281, %v17_v0   ;;  %35 = vperm.xlu0 %279, %v17_v0   ;;  %s326_s22 = smov 94   ;;  %s327_s23 = smov 96   ;;  %vm31_vm0 = vcmp.lt.s32.totalorder %v381_v28, 127  ;;  %vm46_vm1 = vcmp.lt.s32.totalorder %v381_v28, 126  ;;  %vm61_vm2 = vcmp.lt.s32.totalorder %v381_v28, 112  ;;  %vm76_vm3 = vcmp.lt.s32.totalorder %v381_v28, 111 }
   0x8   :  { %220 = vmatprep.mubr.f32.mxu0 %v328_v12  ;;  %226 = vmatprep.mubr.f32.mxu1 %v328_v12  ;;  %vm91_vm4 = vcmp.lt.s32.totalorder %v381_v28, 110  ;;  %vm106_vm5 = vcmp.lt.s32.totalorder %v381_v28, 96  ;;  %vm121_vm6 = vcmp.lt.s32.totalorder %v381_v28, 95  ;;  %vm136_vm7 = vcmp.lt.s32.totalorder %v381_v28, 94  ;;  %s329_s28 = smov [#allocation2]  }
   0x9   :  { %s242_s29 = sshll.u32 %s329_s28, 4  ;;  %s243_s29 = int_to_ptr.vmem [resolvable:$true] %s242_s29 }
   0xa   :  { %s287_s30 = scalar_lea.vmem %s243_s29, 512  ;;  %p292_p1 = scmp.lt.s32.totalorder %s243_s29, %s243_s29 }
   0xb   :  { %25 = vrot.lane.b32.xlu1 %v358_v5, %s315_s17  ;;  %27 = vrot.lane.b32.xlu0 %v363_v6, %s315_s17  ;;  %p288_p0 = scmp.ne.s32.totalorder %s243_s29, %s287_s30  ;;  %p293_p2 = scmp.lt.s32.totalorder %s287_s30, %s287_s30 }
   0xc   :  { %282 = vset.pattern.permute.xlu1 %v316_v7  ;;  %283 = vset.pattern.permute.xlu0 %v317_v8 }
   0xd   :  { %p294_p3 = por %p293_p2, %p292_p1 }
   0xf   :  { %80 = vperm.xlu1 %282, %v17_v0   ;;  %42 = vrot.lane.b32.xlu0 %v358_v5, %s318_s18  ;;  %p295_p4 = pnand %p294_p3, %p288_p0 }
  0x13   :  { %44 = vrot.lane.b32.xlu1 %v363_v6, %s318_s18  ;;  %95 = vperm.xlu0 %283, %v17_v0  }
  0x17   :  { %57 = vrot.lane.b32.xlu1 %v358_v5, %s319_s19  ;;  %284 = vset.pattern.permute.xlu0 %v320_v9 }
  0x18   :  { %110 = vperm.xlu0 %284, %v17_v0  }
  0x1b   :  { %59 = vrot.lane.b32.xlu1 %v363_v6, %s319_s19 }
  0x1c   :  { %285 = vset.pattern.permute.xlu0 %v321_v10 }
  0x1d   :  { %125 = vperm.xlu0 %285, %v17_v0  }
  0x1f   :  { %72 = vrot.lane.b32.xlu1 %v358_v5, %s322_s2 }
  0x21   :  { %286 = vset.pattern.permute.xlu0 %v323_v11 }
  0x22   :  { %140 = vperm.xlu0 %286, %v17_v0  }
  0x23   :  { %74 = vrot.lane.b32.xlu1 %v363_v6, %s322_s2 }
  0x26   :  { %117 = vrot.lane.b32.xlu0 %v358_v5, %s324_s20 }
  0x27   :  { %87 = vrot.lane.b32.xlu1 %v358_v5, %s325_s21 }
  0x2a   :  { %132 = vrot.lane.b32.xlu0 %v358_v5, %s326_s22 }
  0x2b   :  { %89 = vrot.lane.b32.xlu1 %v363_v6, %s325_s21 }
  0x2f   :  { %102 = vrot.lane.b32.xlu1 %v358_v5, %s327_s23 }
  0x33   :  { %104 = vrot.lane.b32.xlu1 %v363_v6, %s327_s23 }
  0x37   :  { %119 = vrot.lane.b32.xlu1 %v363_v6, %s324_s20 }
  0x3b   :  { %134 = vrot.lane.b32.xlu1 %v363_v6, %s326_s22 }
  0x81   :  { %v51_v13 = vpop.permute.xlu1 %50  ;;  %v21_v14 = vpop.permute.xlu0 %20 }
  0x82   :  { %v23_v37 = vmul.f32 %v21_v14, %v358_v5  ;;  %v24_v38 = vmul.f32 %v21_v14, %v363_v6 }
  0x86   :  { %v66_v15 = vpop.permute.xlu1 %65  ;;  %v36_v17 = vpop.permute.xlu0 %35 }
  0x8a   :  { %v26_v16 = vpop.permute.xlu1 %25  ;;  %v28_v19 = vpop.permute.xlu0 %27 }
  0x8b   :  { %v32_v32 = vsel %vm31_vm0, %v26_v16, %v28_v19  ;;  %v33_v33 = vsel %vm31_vm0, %v28_v19, %v26_v16 }
  0x8c   :  { %v38_v39 = vmul.f32 %v36_v17, %v32_v32  ;;  %v39_v40 = vmul.f32 %v36_v17, %v33_v33 }
  0x8e   :  { %v81_v18 = vpop.permute.xlu1 %80  ;;  %v43_v21 = vpop.permute.xlu0 %42  ;;  %v40_v49 = vadd.f32 %v38_v39, %v23_v37  ;;  %v41_v50 = vadd.f32 %v39_v40, %v24_v38 }
  0x92   :  { %v45_v20 = vpop.permute.xlu1 %44  ;;  %v96_v24 = vpop.permute.xlu0 %95 }
  0x93   :  { %v47_v35 = vsel %vm46_vm1, %v43_v21, %v45_v20  ;;  %v48_v36 = vsel %vm46_vm1, %v45_v20, %v43_v21 }
  0x94   :  { %v53_v44 = vmul.f32 %v51_v13, %v47_v35  ;;  %v54_v45 = vmul.f32 %v51_v13, %v48_v36 }
  0x96   :  { %v58_v22 = vpop.permute.xlu1 %57  ;;  %v55_v55 = vadd.f32 %v53_v44, %v40_v49  ;;  %v56_v56 = vadd.f32 %v54_v45, %v41_v50 }
  0x97   :  { %v111_v27 = vpop.permute.xlu0 %110 }
  0x9a   :  { %v60_v23 = vpop.permute.xlu1 %59 }
  0x9b   :  { %v62_v42 = vsel %vm61_vm2, %v58_v22, %v60_v23  ;;  %v63_v43 = vsel %vm61_vm2, %v60_v23, %v58_v22 }
  0x9c   :  { %v126_v31 = vpop.permute.xlu0 %125  ;;  %v68_v51 = vmul.f32 %v66_v15, %v62_v42  ;;  %v69_v52 = vmul.f32 %v66_v15, %v63_v43 }
  0x9e   :  { %v73_v26 = vpop.permute.xlu1 %72  ;;  %v70_v63 = vadd.f32 %v68_v51, %v55_v55  ;;  %v71_v0 = vadd.f32 %v69_v52, %v56_v56 }
  0xa1   :  { %v141_v41 = vpop.permute.xlu0 %140 }
  0xa2   :  { %v75_v29 = vpop.permute.xlu1 %74 }
  0xa3   :  { %v77_v47 = vsel %vm76_vm3, %v73_v26, %v75_v29  ;;  %v78_v48 = vsel %vm76_vm3, %v75_v29, %v73_v26  ;;  %v147_v26 = vld [vmem:[%s412_s1] sm:$0xff] }
  0xa4   :  { %v83_v57 = vmul.f32 %v81_v18, %v77_v47  ;;  %v84_v58 = vmul.f32 %v81_v18, %v78_v48 }
  0xa5   :  { %v118_v60 = vpop.permute.xlu0 %117 }
  0xa6   :  { %v88_v30 = vpop.permute.xlu1 %87  ;;  %v85_v3 = vadd.f32 %v83_v57, %v70_v63  ;;  %v86_v4 = vadd.f32 %v84_v58, %v71_v0 }
  0xa9   :  { %v133_v14 = vpop.permute.xlu0 %132 }
  0xaa   :  { %v90_v34 = vpop.permute.xlu1 %89 }
  0xab   :  { %v92_v53 = vsel %vm91_vm4, %v88_v30, %v90_v34  ;;  %v93_v54 = vsel %vm91_vm4, %v90_v34, %v88_v30 }
  0xac   :  { %v98_v1 = vmul.f32 %v96_v24, %v92_v53  ;;  %v99_v2 = vmul.f32 %v96_v24, %v93_v54 }
  0xae   :  { %v103_v46 = vpop.permute.xlu1 %102  ;;  %v100_v10 = vadd.f32 %v98_v1, %v85_v3  ;;  %v101_v11 = vadd.f32 %v99_v2, %v86_v4 }
  0xb2   :  { %v105_v59 = vpop.permute.xlu1 %104 }
  0xb3   :  { %v107_v61 = vsel %vm106_vm5, %v103_v46, %v105_v59  ;;  %v108_v62 = vsel %vm106_vm5, %v105_v59, %v103_v46 }
  0xb4   :  { %v113_v5 = vmul.f32 %v111_v27, %v107_v61  ;;  %v114_v6 = vmul.f32 %v111_v27, %v108_v62  ;;  %v148_v27 = vld [vmem:[%s412_s1 + $0x8] sm:$0xff] }
  0xb6   :  { %v120_v7 = vpop.permute.xlu1 %119  ;;  %v115_v15 = vadd.f32 %v113_v5, %v100_v10  ;;  %v116_v16 = vadd.f32 %v114_v6, %v101_v11 }
  0xb7   :  { %v122_v8 = vsel %vm121_vm6, %v118_v60, %v120_v7  ;;  %v123_v9 = vsel %vm121_vm6, %v120_v7, %v118_v60 }
  0xb8   :  { %v128_v12 = vmul.f32 %v126_v31, %v122_v8  ;;  %v129_v13 = vmul.f32 %v126_v31, %v123_v9 }
  0xba   :  { %v135_v17 = vpop.permute.xlu1 %134  ;;  %v131_v22 = vadd.f32 %v129_v13, %v116_v16  ;;  %v130_v23 = vadd.f32 %v128_v12, %v115_v15 }
  0xbb   :  { %v137_v18 = vsel %vm136_vm7, %v133_v14, %v135_v17  ;;  %v138_v19 = vsel %vm136_vm7, %v135_v17, %v133_v14 }
  0xbc   :  { %v143_v20 = vmul.f32 %v141_v41, %v137_v18  ;;  %v144_v21 = vmul.f32 %v141_v41, %v138_v19 }
  0xbe   :  { %v146_v24 = vadd.f32 %v144_v21, %v131_v22  ;;  %v145_v25 = vadd.f32 %v143_v20, %v130_v23 }
  0xc0   :  { %156 = vmatprep.subr.mxu0 %v146_v24  ;;  %255 = vmatprep.subr.mxu1 %v146_v24 }
  0xc1   :  { %157 = vmatpush1.msra.mxu0 %v145_v25  ;;  %256 = vmatpush1.msra.mxu1 %v145_v25 }
  0xc2   :  { %253 = vmatmul.mubr.msk.f32.vlgmr.msra.gmra.mrb[0].mxu0 %vm149_vm8, %v147_v26  ;;  %254 = vmatmul.mubr.msk.f32.vlgmr.msra.gmra.mrb[0].mxu1 %vm149_vm8, %v148_v27 }
 0x195   :  { %v222_v28 = vpop.f32.mrb[0].mxu0  ;;  %v228_v29 = vpop.f32.mrb[0].mxu1 }
 0x196   :  { %233 = vst [vmem:[#allocation2] sm:$0xff] %v222_v28  ;;  %235 = vst [vmem:[#allocation2 + $0x10] sm:$0xff] %v228_v29  ;;  %v224_v30 = vpop.f32.mrb[1].mxu0  ;;  %v230_v31 = vpop.f32.mrb[1].mxu1 }
 0x197   :  { %234 = vst [vmem:[#allocation2 + $0x8] sm:$0xff] %v224_v30  ;;  %236 = vst [vmem:[#allocation2 + $0x18] sm:$0xff] %v230_v31 }
 0x198   :  { %298 = shalt.err (!%p295_p4)
}
 0x199   :  { %s299_s5 = scalar_lea.hbm %s414_s3, 512 }
 0x19a   :  { %p300_p5 = scmp.ne.s32.totalorder %s414_s3, %s299_s5  ;;  %p303_p6 = scmp.lt.u32.totalorder %s299_s5, %s414_s3 }
 0x19c   :  { %p305_p7 = pnand %p303_p6, %p300_p5 }
 0x19e   :  { %308 = shalt.err (!%p305_p7)
}
 0x19f   :  { %s330_s10 = smov 256   ;;  %s331_s11 = smov 16  }
 0x1a0   :  { %248 = dma.vmem_to_hbm [thread:$0]  %s243_s29, 512, %s414_s3, [#allocation3], %s330_s10, %s330_s10, %s331_s11  }
 0x1a1   :  { %309 = dma.done.wait [#allocation3], 512  }
 0x1a2   :  { %310 = vsyncadd [#allocation3], 4294966784 }
 0x1a3   :  { %252 = vsyncpa [#allocation3], 1 }

</bundles_post_ra>
